<compile_context>
chip_gen: v6e
topology: v6e:2x2x1
jax: 0.10.0
libtpu: 0.0.40
codegen_flags: <defaults>
</compile_context>

<pallas_src>
import jax
import jax.numpy as jnp
import numpy as np
from jax import lax
from jax.experimental import pallas as pl
from jax.experimental.pallas import tpu as pltpu

LEAKY_SLOPE = 0.01  # torch.nn.LeakyReLU() default negative_slope


def _leaky_relu(v):
    return jnp.where(v >= 0, v, LEAKY_SLOPE * v)


def make_gnn_kernel(n_real, use_mxu_agg):
    """Build the kernel closed over static config (real node count, agg path)."""
    f32 = jnp.float32
    bf16 = jnp.bfloat16

    def kernel(eps_ref, a_ref, x_ref,
               w1a_ref, b1a_ref, w1b_ref, b1b_ref,
               w2a_ref, b2a_ref, w2b_ref, b2b_ref,
               wl1_ref, wl2_ref, bl_ref,
               out_ref):
        G, n, f_in = x_ref.shape          # graphs per block, padded nodes per graph
        A = a_ref[...]                    # [G, n, n] bf16, A[g, dst, src] = w

        if use_mxu_agg:
            # Large graphs: batched bf16 matmul on the MXU, f32 accumulation.
            def aggregate(feat3):         # feat3: [G, n, F] f32
                return jnp.einsum('gij,gjf->gif', A, feat3.astype(bf16),
                                  preferred_element_type=f32)
        else:
            # Small graphs: G tiny MXU matmuls would leave the systolic array
            # ~99% idle; do the n^2*F MACs on the VPU instead (f32 — v5e has no
            # bf16 VALU).  Broadcast-multiply + sublane-reduce over src nodes.
            A_bc = A.astype(f32)[:, :, :, None]          # [G, n_dst, n_src, 1]
            def aggregate(feat3):         # feat3: [G, n, F] f32
                return jnp.sum(A_bc * feat3[:, None, :, :], axis=2)

        x3 = x_ref[...].astype(f32)                       # [G, n, f_in]
        x2d = x3.reshape(G * n, f_in)

        # ---- GIN layer 1:  MLP1((1 + eps1) * x + A @ x) ----
        z1 = (1.0 + eps_ref[0]) * x2d + aggregate(x3).reshape(G * n, f_in)
        m1 = _leaky_relu(jnp.dot(z1.astype(bf16), w1a_ref[...],
                                 preferred_element_type=f32) + b1a_ref[...])
        h1 = jnp.dot(m1.astype(bf16), w1b_ref[...],
                     preferred_element_type=f32) + b1b_ref[...]
        h1_dim = h1.shape[-1]

        # between-layer activation; Dropout(p=0) is the identity
        x2 = _leaky_relu(h1)

        # ---- GIN layer 2 ----
        agg2 = aggregate(x2.reshape(G, n, h1_dim)).reshape(G * n, h1_dim)
        z2 = (1.0 + eps_ref[1]) * x2 + agg2
        m2 = _leaky_relu(jnp.dot(z2.astype(bf16), w2a_ref[...],
                                 preferred_element_type=f32) + b2a_ref[...])
        h2 = jnp.dot(m2.astype(bf16), w2b_ref[...],
                     preferred_element_type=f32) + b2b_ref[...]
        h2_dim = h2.shape[-1]

        # ---- global_add_pool over the REAL nodes only (padded nodes picked up
        #      bias terms through the MLPs, so mask them before the sum) ----
        h1_3 = h1.reshape(G, n, h1_dim)
        h2_3 = h2.reshape(G, n, h2_dim)
        if n != n_real:
            mask = (lax.broadcasted_iota(jnp.int32, (1, n, 1), 1) < n_real).astype(f32)
            h1_3 = h1_3 * mask
            h2_3 = h2_3 * mask
        hp1 = jnp.sum(h1_3, axis=1)                       # [G, H1]
        hp2 = jnp.sum(h2_3, axis=1)                       # [G, H2]

        # ---- head: Linear(concat([hp1, hp2])) in exact split form; lane-padded
        #      weights -> dense (unmasked) vst on the output.  Tiny matmul ->
        #      keep it f32 for accuracy. ----
        out_ref[0] = (jnp.dot(hp1, wl1_ref[...], preferred_element_type=f32)
                      + jnp.dot(hp2, wl2_ref[...], preferred_element_type=f32)
                      + bl_ref[...])

    return kernel


def _tpu_vmem_capacity_bytes():
    """Generation-aware VMEM capacity.  Falls back to 64 MiB (v7x per-core size,
    the smallest across v5e/v6e/v7x) if the query is unavailable."""
    cap = 64 * 1024 * 1024
    try:
        info = pltpu.get_tpu_info()
        cap = int(getattr(info, "vmem_capacity_bytes", cap)) or cap
    except Exception:
        cap = 64 * 1024 * 1024
    return cap


def _choose_graphs_per_block(batch_size, n_pad, f_in, hid1, h1_dim, hid2, h2_dim,
                             out_pad, use_vpu_agg, budget_bytes, target_rows=512):
    """Largest G (graphs per grid step) such that: G divides batch_size, the block
    has ~target_rows matmul rows, the estimated VMEM footprint fits the budget,
    and (when batch_size >= 2) the grid keeps >= 2 steps so v7x's two
    TensorCores both get work.  No g%8 constraint: tile legality is guaranteed
    by full-extent trailing block dims + n_pad being a multiple of 8."""
    def est_bytes(g):
        rows = g * n_pad
        adj = g * n_pad * n_pad * 2                     # bf16, streamed per step
        xblk = rows * f_in * 2                          # bf16, streamed per step
        outblk = g * out_pad * 4
        streamed = 2 * (adj + xblk + outblk)            # double-buffered pipeline
        act = 4 * rows * (2 * f_in + hid1 + 3 * h1_dim + hid2 + 2 * h2_dim)
        agg_tmp = 4 * g * n_pad * n_pad * max(f_in, h1_dim) if use_vpu_agg else 0
        return int(1.5 * (streamed + act + agg_tmp))    # 1.5x safety margin

    cap = max(1, target_rows // n_pad)
    if batch_size >= 2:
        cap = min(cap, batch_size // 2)                 # guarantee >= 2 grid steps
    cap = max(1, min(cap, batch_size))
    best = 1
    for g in range(1, cap + 1):
        if batch_size % g == 0 and est_bytes(g) <= budget_bytes:
            best = g
    return best


def gnn_forward(x, edge_index, edge_weight, params, batch_size, n_nodes):
    """x: [B*n_nodes, F_in] f32 (graph-major node order, as the module implies),
    edge_index: [2, E] int32 (row0=src, row1=dst), edge_weight: [E] f32.
    NOTE: assumes fixed n_nodes per graph and no cross-graph edges; violating
    inputs would silently produce a wrong per-graph adjacency."""
    N, f_in = x.shape
    assert N == batch_size * n_nodes
    output_dim = params["bl"].shape[-1]
    out_pad = ((output_dim + 127) // 128) * 128
    n_pad = ((n_nodes + 7) // 8) * 8          # sublane-aligned node count

    # --- glue: densify the sparse graph per graph (block-diagonal structure) ---
    g_idx = edge_index[1] // n_nodes
    dst_l = edge_index[1] % n_nodes
    src_l = edge_index[0] % n_nodes
    adj = (jnp.zeros((batch_size, n_pad, n_pad), jnp.float32)
           .at[g_idx, dst_l, src_l].add(edge_weight)).astype(jnp.bfloat16)
    # TODO(synk): for very large / very sparse graphs, scalar-prefetch a per-graph
    # CSR edge list (PrefetchScalarGridSpec) and aggregate with an in-kernel
    # segment-sum instead of densifying B*n^2 adjacency in HBM.

    # --- node features as [B, n_pad, F_in] bf16 (zero rows for padded nodes) ---
    x3 = x.reshape(batch_size, n_nodes, f_in)
    if n_pad != n_nodes:
        x3 = jnp.pad(x3, ((0, 0), (0, n_pad - n_nodes), (0, 0)))
    x3 = x3.astype(jnp.bfloat16)

    eps = jnp.concatenate([params["eps1"].reshape(-1),
                           params["eps2"].reshape(-1)]).astype(jnp.float32)

    def pad_lanes(w):     # lane-dense output store for the head
        return jnp.pad(w, ((0, 0), (0, out_pad - w.shape[-1])))

    bf16 = jnp.bfloat16
    # MLP weights bf16 (MXU-native, halves resident VMEM/DMA); biases and the
    # tiny head stay f32.
    weights = (params["w1a"].astype(bf16), params["b1a"],
               params["w1b"].astype(bf16), params["b1b"],
               params["w2a"].astype(bf16), params["b2a"],
               params["w2b"].astype(bf16), params["b2b"],
               pad_lanes(params["wl1"]), pad_lanes(params["wl2"]),
               pad_lanes(params["bl"]))

    hid1, h1_dim = params["w1a"].shape[-1], params["w1b"].shape[-1]
    hid2, h2_dim = params["w2a"].shape[-1], params["w2b"].shape[-1]

    use_mxu_agg = n_pad > 32   # tiny graphs -> VPU aggregation, big graphs -> MXU
    vmem_cap = _tpu_vmem_capacity_bytes()
    vmem_limit = min((vmem_cap * 3) // 4, 96 * 1024 * 1024)   # ~96 MiB v5e/v6e, ~48 MiB v7x
    G = _choose_graphs_per_block(batch_size, n_pad, f_in, hid1, h1_dim, hid2, h2_dim,
                                 out_pad, use_vpu_agg=not use_mxu_agg,
                                 budget_bytes=int(vmem_limit * 0.7))
    num_blocks = batch_size // G

    def resident(arr):    # full-array block, constant index -> DMA'd once, stays VMEM-resident
        nd = arr.ndim
        return pl.BlockSpec(arr.shape, lambda g, _nd=nd: (0,) * _nd)

    in_specs = (
        [pl.BlockSpec(memory_space=pltpu.MemorySpace.SMEM),               # eps scalars
         pl.BlockSpec((G, n_pad, n_pad), lambda g: (g, 0, 0)),            # adjacency tile (bf16)
         pl.BlockSpec((G, n_pad, f_in), lambda g: (g, 0, 0))]             # node-feature tile (bf16)
        + [resident(w) for w in weights])

    kernel = make_gnn_kernel(n_nodes, use_mxu_agg)

    out = pl.pallas_call(
        kernel,
        # (num_blocks, G, out_pad): trailing block dims equal full extents, so
        # any G is tile-legal; wrapper reshapes back to (batch, out_pad).
        out_shape=jax.ShapeDtypeStruct((num_blocks, G, out_pad), jnp.float32),
        grid=(num_blocks,),
        in_specs=in_specs,
        out_specs=pl.BlockSpec((1, G, out_pad), lambda g: (g, 0, 0)),
        compiler_params=pltpu.CompilerParams(
            dimension_semantics=("parallel",),      # shard graph blocks across v7x's 2 TCs
            vmem_limit_bytes=int(vmem_limit)),
    )(eps, adj, x3, *weights)

    return out.reshape(batch_size, out_pad)[:, :output_dim]


def gnn_reference(x, edge_index, edge_weight, batch_vec, params, batch_size):
    """Pure-JAX (f32, dense N x N) reference matching the PyTorch forward semantics."""
    N = x.shape[0]
    A = jnp.zeros((N, N), jnp.float32).at[edge_index[1], edge_index[0]].add(edge_weight)
    P = (batch_vec[None, :] == jnp.arange(batch_size)[:, None]).astype(jnp.float32)
    leaky = lambda v: jnp.where(v >= 0, v, LEAKY_SLOPE * v)

    z1 = (1.0 + params["eps1"][0, 0]) * x + A @ x
    h1 = leaky(z1 @ params["w1a"] + params["b1a"]) @ params["w1b"] + params["b1b"]
    x2 = leaky(h1)
    z2 = (1.0 + params["eps2"][0, 0]) * x2 + A @ x2
    h2 = leaky(z2 @ params["w2a"] + params["b2a"]) @ params["w2b"] + params["b2b"]

    h = jnp.concatenate([h1, h2], axis=-1)
    hp = P @ h
    wl = jnp.concatenate([params["wl1"], params["wl2"]], axis=0)
    return hp @ wl + params["bl"]


if __name__ == "__main__":
    # module config: GNN(input_dim=4, hidden_dims=[32, 32], output_dim=8,
    #                    n_nodes=8, batch_size=2, gnn_type='GIN', pooling='sum')
    input_dim, hidden_dims, output_dim = 4, [32, 32], 8
    n_nodes, batch_size = 8, 2
    N = n_nodes * batch_size

    key = jax.random.PRNGKey(0)
    keys = jax.random.split(key, 16)

    # node features [batch * node, feature]
    x = jax.random.normal(keys[0], (N, input_dim), jnp.float32)

    # deterministic graph: bidirectional ring inside each of the 2 graphs
    src_list, dst_list = [], []
    for b in range(batch_size):
        off = b * n_nodes
        for i in range(n_nodes):
            j = (i + 1) % n_nodes
            src_list += [off + i, off + j]
            dst_list += [off + j, off + i]
    edge_index = jnp.array([src_list, dst_list], dtype=jnp.int32)   # [2, |E|]
    E = edge_index.shape[1]
    edge_weight = jax.random.uniform(keys[1], (E,), jnp.float32)    # [|E|]
    batch_vec = jnp.repeat(jnp.arange(batch_size, dtype=jnp.int32), n_nodes)

    # deterministic parameters (weights stored [in, out]; biases [1, out];
    # GIN eps initialized to 0.0 as in wGINConv(eps=0.0, train_eps=True))
    hid1 = min(input_dim, hidden_dims[0])        # 4
    hid2 = min(hidden_dims[0], hidden_dims[1])   # 32
    w = lambda k, shape: 0.1 * jax.random.normal(k, shape, jnp.float32)
    params = dict(
        w1a=w(keys[2], (input_dim, hid1)),        b1a=w(keys[3], (1, hid1)),
        w1b=w(keys[4], (hid1, hidden_dims[0])),   b1b=w(keys[5], (1, hidden_dims[0])),
        eps1=jnp.zeros((1, 1), jnp.float32),
        w2a=w(keys[6], (hidden_dims[0], hid2)),   b2a=w(keys[7], (1, hid2)),
        w2b=w(keys[8], (hid2, hidden_dims[1])),   b2b=w(keys[9], (1, hidden_dims[1])),
        eps2=jnp.zeros((1, 1), jnp.float32),
        wl1=w(keys[10], (hidden_dims[0], output_dim)),
        wl2=w(keys[11], (hidden_dims[1], output_dim)),
        bl=w(keys[12], (1, output_dim)),
    )

    out = gnn_forward(x, edge_index, edge_weight, params, batch_size, n_nodes)
    jax.block_until_ready(out)
    assert out.shape == (batch_size, output_dim)

    ref = gnn_reference(x, edge_index, edge_weight, batch_vec, params, batch_size)
    # tolerance loosened vs the pure-f32 reference: edge weights, node features
    # and MLP matmul operands go through bf16 (accumulation stays f32)
    np.testing.assert_allclose(np.asarray(out), np.asarray(ref), rtol=2e-2, atol=2e-2)

    print("KERNEL_OK")
</pallas_src>

<mosaic_0001>
module attributes {stable_mosaic.version = 11 : i64} {
  func.func @kernel(%arg0: i32, %arg1: memref<2xf32, #tpu.memory_space<smem>>, %arg2: memref<1x8x8xbf16, #tpu.memory_space<vmem>>, %arg3: memref<1x8x4xbf16, #tpu.memory_space<vmem>>, %arg4: memref<4x4xbf16, #tpu.memory_space<vmem>>, %arg5: memref<1x4xf32, #tpu.memory_space<vmem>>, %arg6: memref<4x32xbf16, #tpu.memory_space<vmem>>, %arg7: memref<1x32xf32, #tpu.memory_space<vmem>>, %arg8: memref<32x32xbf16, #tpu.memory_space<vmem>>, %arg9: memref<1x32xf32, #tpu.memory_space<vmem>>, %arg10: memref<32x32xbf16, #tpu.memory_space<vmem>>, %arg11: memref<1x32xf32, #tpu.memory_space<vmem>>, %arg12: memref<32x128xf32, #tpu.memory_space<vmem>>, %arg13: memref<32x128xf32, #tpu.memory_space<vmem>>, %arg14: memref<1x128xf32, #tpu.memory_space<vmem>>, %arg15: memref<1x1x128xf32, #tpu.memory_space<vmem>>) attributes {dimension_semantics = [#tpu.dimension_semantics<parallel>], iteration_bounds = array<i64: 2>, scalar_prefetch = 0 : i64, scratch_operands = 0 : i64, tpu.core_type = #tpu.core_type<tc>, window_params = [{transform_indices = @transform_0, window_bounds = array<i64: 2>}, {transform_indices = @transform_1, window_bounds = array<i64: 1, 8, 8>}, {transform_indices = @transform_2, window_bounds = array<i64: 1, 8, 4>}, {pipeline_mode = #tpu.pipeline_mode<synchronous>, transform_indices = @transform_3, window_bounds = array<i64: 4, 4>}, {pipeline_mode = #tpu.pipeline_mode<synchronous>, transform_indices = @transform_4, window_bounds = array<i64: 1, 4>}, {pipeline_mode = #tpu.pipeline_mode<synchronous>, transform_indices = @transform_5, window_bounds = array<i64: 4, 32>}, {pipeline_mode = #tpu.pipeline_mode<synchronous>, transform_indices = @transform_6, window_bounds = array<i64: 1, 32>}, {pipeline_mode = #tpu.pipeline_mode<synchronous>, transform_indices = @transform_7, window_bounds = array<i64: 32, 32>}, {pipeline_mode = #tpu.pipeline_mode<synchronous>, transform_indices = @transform_8, window_bounds = array<i64: 1, 32>}, {pipeline_mode = #tpu.pipeline_mode<synchronous>, transform_indices = @transform_9, window_bounds = array<i64: 32, 32>}, {pipeline_mode = #tpu.pipeline_mode<synchronous>, transform_indices = @transform_10, window_bounds = array<i64: 1, 32>}, {pipeline_mode = #tpu.pipeline_mode<synchronous>, transform_indices = @transform_11, window_bounds = array<i64: 32, 128>}, {pipeline_mode = #tpu.pipeline_mode<synchronous>, transform_indices = @transform_12, window_bounds = array<i64: 32, 128>}, {pipeline_mode = #tpu.pipeline_mode<synchronous>, transform_indices = @transform_13, window_bounds = array<i64: 1, 128>}, {transform_indices = @transform_14, window_bounds = array<i64: 1, 1, 128>}]} {
    %c0 = arith.constant 0 : index
    %c0_0 = arith.constant 0 : index
    %c0_1 = arith.constant 0 : index
    %0 = vector.load %arg2[%c0, %c0_0, %c0_1] : memref<1x8x8xbf16, #tpu.memory_space<vmem>>, vector<1x8x8xbf16>
    %1 = arith.extf %0 : vector<1x8x8xbf16> to vector<1x8x8xf32>
    %2 = vector.shape_cast %1 : vector<1x8x8xf32> to vector<1x8x8x1xf32>
    %c0_2 = arith.constant 0 : index
    %c0_3 = arith.constant 0 : index
    %c0_4 = arith.constant 0 : index
    %3 = vector.load %arg3[%c0_2, %c0_3, %c0_4] : memref<1x8x4xbf16, #tpu.memory_space<vmem>>, vector<1x8x4xbf16>
    %4 = arith.extf %3 : vector<1x8x4xbf16> to vector<1x8x4xf32>
    %5 = vector.shape_cast %4 : vector<1x8x4xf32> to vector<8x4xf32>
    %c0_5 = arith.constant 0 : index
    %6 = memref.load %arg1[%c0_5] : memref<2xf32, #tpu.memory_space<smem>>
    %cst = arith.constant 1.000000e+00 : f32
    %7 = arith.addf %cst, %6 : f32
    %8 = vector.broadcast %7 : f32 to vector<8x4xf32>
    %9 = arith.mulf %8, %5 : vector<8x4xf32>
    %10 = vector.shape_cast %4 : vector<1x8x4xf32> to vector<1x1x8x4xf32>
    %11 = vector.broadcast %2 : vector<1x8x8x1xf32> to vector<1x8x8x4xf32>
    %12 = vector.broadcast %10 : vector<1x1x8x4xf32> to vector<1x8x8x4xf32>
    %13 = arith.mulf %11, %12 : vector<1x8x8x4xf32>
    %cst_6 = arith.constant dense<0.000000e+00> : vector<1x8x4xf32>
    %14 = vector.multi_reduction <add>, %13, %cst_6 [2] : vector<1x8x8x4xf32> to vector<1x8x4xf32>
    %15 = vector.shape_cast %14 : vector<1x8x4xf32> to vector<8x4xf32>
    %16 = arith.addf %9, %15 : vector<8x4xf32>
    %17 = arith.truncf %16 : vector<8x4xf32> to vector<8x4xbf16>
    %c0_7 = arith.constant 0 : index
    %c0_8 = arith.constant 0 : index
    %18 = vector.load %arg4[%c0_7, %c0_8] : memref<4x4xbf16, #tpu.memory_space<vmem>>, vector<4x4xbf16>
    %cst_9 = arith.constant dense<0.000000e+00> : vector<8x4xf32>
    %19 = tpu.matmul %17, %18, %cst_9 {dimension_numbers = #tpu.dot_dimension_numbers<[1], [0], [0], [1], [0, 0, 1, 1], [], []>} : vector<8x4xbf16>, vector<4x4xbf16>, vector<8x4xf32> -> vector<8x4xf32>
    %c0_10 = arith.constant 0 : index
    %c0_11 = arith.constant 0 : index
    %20 = vector.load %arg5[%c0_10, %c0_11] : memref<1x4xf32, #tpu.memory_space<vmem>>, vector<1x4xf32>
    %21 = vector.broadcast %20 : vector<1x4xf32> to vector<8x4xf32>
    %22 = arith.addf %19, %21 : vector<8x4xf32>
    %cst_12 = arith.constant 0.000000e+00 : f32
    %23 = vector.broadcast %cst_12 : f32 to vector<8x4xf32>
    %24 = arith.cmpf oge, %22, %23 : vector<8x4xf32>
    %cst_13 = arith.constant 0.00999999977 : f32
    %25 = vector.broadcast %cst_13 : f32 to vector<8x4xf32>
    %26 = arith.mulf %25, %22 : vector<8x4xf32>
    %27 = arith.select %24, %22, %26 : vector<8x4xi1>, vector<8x4xf32>
    %28 = arith.truncf %27 : vector<8x4xf32> to vector<8x4xbf16>
    %c0_14 = arith.constant 0 : index
    %c0_15 = arith.constant 0 : index
    %29 = vector.load %arg6[%c0_14, %c0_15] : memref<4x32xbf16, #tpu.memory_space<vmem>>, vector<4x32xbf16>
    %cst_16 = arith.constant dense<0.000000e+00> : vector<8x32xf32>
    %30 = tpu.matmul %28, %29, %cst_16 {dimension_numbers = #tpu.dot_dimension_numbers<[1], [0], [0], [1], [0, 0, 1, 1], [], []>} : vector<8x4xbf16>, vector<4x32xbf16>, vector<8x32xf32> -> vector<8x32xf32>
    %c0_17 = arith.constant 0 : index
    %c0_18 = arith.constant 0 : index
    %31 = vector.load %arg7[%c0_17, %c0_18] : memref<1x32xf32, #tpu.memory_space<vmem>>, vector<1x32xf32>
    %32 = vector.broadcast %31 : vector<1x32xf32> to vector<8x32xf32>
    %33 = arith.addf %30, %32 : vector<8x32xf32>
    %cst_19 = arith.constant 0.000000e+00 : f32
    %34 = vector.broadcast %cst_19 : f32 to vector<8x32xf32>
    %35 = arith.cmpf oge, %33, %34 : vector<8x32xf32>
    %cst_20 = arith.constant 0.00999999977 : f32
    %36 = vector.broadcast %cst_20 : f32 to vector<8x32xf32>
    %37 = arith.mulf %36, %33 : vector<8x32xf32>
    %38 = arith.select %35, %33, %37 : vector<8x32xi1>, vector<8x32xf32>
    %39 = vector.shape_cast %38 : vector<8x32xf32> to vector<1x8x32xf32>
    %40 = vector.shape_cast %39 : vector<1x8x32xf32> to vector<1x1x8x32xf32>
    %41 = vector.broadcast %2 : vector<1x8x8x1xf32> to vector<1x8x8x32xf32>
    %42 = vector.broadcast %40 : vector<1x1x8x32xf32> to vector<1x8x8x32xf32>
    %43 = arith.mulf %41, %42 : vector<1x8x8x32xf32>
    %cst_21 = arith.constant dense<0.000000e+00> : vector<1x8x32xf32>
    %44 = vector.multi_reduction <add>, %43, %cst_21 [2] : vector<1x8x8x32xf32> to vector<1x8x32xf32>
    %45 = vector.shape_cast %44 : vector<1x8x32xf32> to vector<8x32xf32>
    %c1 = arith.constant 1 : index
    %46 = memref.load %arg1[%c1] : memref<2xf32, #tpu.memory_space<smem>>
    %cst_22 = arith.constant 1.000000e+00 : f32
    %47 = arith.addf %cst_22, %46 : f32
    %48 = vector.broadcast %47 : f32 to vector<8x32xf32>
    %49 = arith.mulf %48, %38 : vector<8x32xf32>
    %50 = arith.addf %49, %45 : vector<8x32xf32>
    %51 = arith.truncf %50 : vector<8x32xf32> to vector<8x32xbf16>
    %c0_23 = arith.constant 0 : index
    %c0_24 = arith.constant 0 : index
    %52 = vector.load %arg8[%c0_23, %c0_24] : memref<32x32xbf16, #tpu.memory_space<vmem>>, vector<32x32xbf16>
    %cst_25 = arith.constant dense<0.000000e+00> : vector<8x32xf32>
    %53 = tpu.matmul %51, %52, %cst_25 {dimension_numbers = #tpu.dot_dimension_numbers<[1], [0], [0], [1], [0, 0, 1, 1], [], []>} : vector<8x32xbf16>, vector<32x32xbf16>, vector<8x32xf32> -> vector<8x32xf32>
    %c0_26 = arith.constant 0 : index
    %c0_27 = arith.constant 0 : index
    %54 = vector.load %arg9[%c0_26, %c0_27] : memref<1x32xf32, #tpu.memory_space<vmem>>, vector<1x32xf32>
    %55 = vector.broadcast %54 : vector<1x32xf32> to vector<8x32xf32>
    %56 = arith.addf %53, %55 : vector<8x32xf32>
    %cst_28 = arith.constant 0.000000e+00 : f32
    %57 = vector.broadcast %cst_28 : f32 to vector<8x32xf32>
    %58 = arith.cmpf oge, %56, %57 : vector<8x32xf32>
    %cst_29 = arith.constant 0.00999999977 : f32
    %59 = vector.broadcast %cst_29 : f32 to vector<8x32xf32>
    %60 = arith.mulf %59, %56 : vector<8x32xf32>
    %61 = arith.select %58, %56, %60 : vector<8x32xi1>, vector<8x32xf32>
    %62 = arith.truncf %61 : vector<8x32xf32> to vector<8x32xbf16>
    %c0_30 = arith.constant 0 : index
    %c0_31 = arith.constant 0 : index
    %63 = vector.load %arg10[%c0_30, %c0_31] : memref<32x32xbf16, #tpu.memory_space<vmem>>, vector<32x32xbf16>
    %cst_32 = arith.constant dense<0.000000e+00> : vector<8x32xf32>
    %64 = tpu.matmul %62, %63, %cst_32 {dimension_numbers = #tpu.dot_dimension_numbers<[1], [0], [0], [1], [0, 0, 1, 1], [], []>} : vector<8x32xbf16>, vector<32x32xbf16>, vector<8x32xf32> -> vector<8x32xf32>
    %c0_33 = arith.constant 0 : index
    %c0_34 = arith.constant 0 : index
    %65 = vector.load %arg11[%c0_33, %c0_34] : memref<1x32xf32, #tpu.memory_space<vmem>>, vector<1x32xf32>
    %66 = vector.broadcast %65 : vector<1x32xf32> to vector<8x32xf32>
    %67 = arith.addf %64, %66 : vector<8x32xf32>
    %68 = vector.shape_cast %33 : vector<8x32xf32> to vector<1x8x32xf32>
    %69 = vector.shape_cast %67 : vector<8x32xf32> to vector<1x8x32xf32>
    %cst_35 = arith.constant dense<0.000000e+00> : vector<1x32xf32>
    %70 = vector.multi_reduction <add>, %68, %cst_35 [1] : vector<1x8x32xf32> to vector<1x32xf32>
    %cst_36 = arith.constant dense<0.000000e+00> : vector<1x32xf32>
    %71 = vector.multi_reduction <add>, %69, %cst_36 [1] : vector<1x8x32xf32> to vector<1x32xf32>
    %c0_37 = arith.constant 0 : index
    %c0_38 = arith.constant 0 : index
    %72 = vector.load %arg12[%c0_37, %c0_38] : memref<32x128xf32, #tpu.memory_space<vmem>>, vector<32x128xf32>
    %cst_39 = arith.constant dense<0.000000e+00> : vector<1x128xf32>
    %73 = tpu.matmul %70, %72, %cst_39 {dimension_numbers = #tpu.dot_dimension_numbers<[1], [0], [0], [1], [0, 0, 1, 1], [], []>} : vector<1x32xf32>, vector<32x128xf32>, vector<1x128xf32> -> vector<1x128xf32>
    %c0_40 = arith.constant 0 : index
    %c0_41 = arith.constant 0 : index
    %74 = vector.load %arg13[%c0_40, %c0_41] : memref<32x128xf32, #tpu.memory_space<vmem>>, vector<32x128xf32>
    %cst_42 = arith.constant dense<0.000000e+00> : vector<1x128xf32>
    %75 = tpu.matmul %71, %74, %cst_42 {dimension_numbers = #tpu.dot_dimension_numbers<[1], [0], [0], [1], [0, 0, 1, 1], [], []>} : vector<1x32xf32>, vector<32x128xf32>, vector<1x128xf32> -> vector<1x128xf32>
    %76 = arith.addf %73, %75 : vector<1x128xf32>
    %c0_43 = arith.constant 0 : index
    %c0_44 = arith.constant 0 : index
    %77 = vector.load %arg14[%c0_43, %c0_44] : memref<1x128xf32, #tpu.memory_space<vmem>>, vector<1x128xf32>
    %78 = arith.addf %76, %77 : vector<1x128xf32>
    %c0_45 = arith.constant 0 : index
    %c0_46 = arith.constant 0 : index
    %c0_47 = arith.constant 0 : index
    %79 = vector.load %arg15[%c0_45, %c0_46, %c0_47] : memref<1x1x128xf32, #tpu.memory_space<vmem>>, vector<1x1x128xf32>
    %80 = vector.shape_cast %79 : vector<1x1x128xf32> to vector<1x128xf32>
    %81 = vector.shape_cast %78 : vector<1x128xf32> to vector<1x1x128xf32>
    tpu.vector_store %arg15[%c0_45, %c0_46, %c0_47], %81 {strides = array<i32>} : memref<1x1x128xf32, #tpu.memory_space<vmem>>, vector<1x1x128xf32>,
    return
  }
  func.func @transform_0(%arg0: i32) -> i32 {
    %c0_i32 = arith.constant 0 : i32
    %c0_i32_0 = arith.constant 0 : i32
    return %c0_i32 : i32
  }
  func.func @transform_1(%arg0: i32) -> (i32, i32, i32) {
    %c0_i32 = arith.constant 0 : i32
    %c0_i32_0 = arith.constant 0 : i32
    %c0_i32_1 = arith.constant 0 : i32
    return %arg0, %c0_i32, %c0_i32_0 : i32, i32, i32
  }
  func.func @transform_2(%arg0: i32) -> (i32, i32, i32) {
    %c0_i32 = arith.constant 0 : i32
    %c0_i32_0 = arith.constant 0 : i32
    %c0_i32_1 = arith.constant 0 : i32
    return %arg0, %c0_i32, %c0_i32_0 : i32, i32, i32
  }
  func.func @transform_3(%arg0: i32) -> (i32, i32) {
    %c0_i32 = arith.constant 0 : i32
    %c0_i32_0 = arith.constant 0 : i32
    %c0_i32_1 = arith.constant 0 : i32
    return %c0_i32, %c0_i32_0 : i32, i32
  }
  func.func @transform_4(%arg0: i32) -> (i32, i32) {
    %c0_i32 = arith.constant 0 : i32
    %c0_i32_0 = arith.constant 0 : i32
    %c0_i32_1 = arith.constant 0 : i32
    return %c0_i32, %c0_i32_0 : i32, i32
  }
  func.func @transform_5(%arg0: i32) -> (i32, i32) {
    %c0_i32 = arith.constant 0 : i32
    %c0_i32_0 = arith.constant 0 : i32
    %c0_i32_1 = arith.constant 0 : i32
    return %c0_i32, %c0_i32_0 : i32, i32
  }
  func.func @transform_6(%arg0: i32) -> (i32, i32) {
    %c0_i32 = arith.constant 0 : i32
    %c0_i32_0 = arith.constant 0 : i32
    %c0_i32_1 = arith.constant 0 : i32
    return %c0_i32, %c0_i32_0 : i32, i32
  }
  func.func @transform_7(%arg0: i32) -> (i32, i32) {
    %c0_i32 = arith.constant 0 : i32
    %c0_i32_0 = arith.constant 0 : i32
    %c0_i32_1 = arith.constant 0 : i32
    return %c0_i32, %c0_i32_0 : i32, i32
  }
  func.func @transform_8(%arg0: i32) -> (i32, i32) {
    %c0_i32 = arith.constant 0 : i32
    %c0_i32_0 = arith.constant 0 : i32
    %c0_i32_1 = arith.constant 0 : i32
    return %c0_i32, %c0_i32_0 : i32, i32
  }
  func.func @transform_9(%arg0: i32) -> (i32, i32) {
    %c0_i32 = arith.constant 0 : i32
    %c0_i32_0 = arith.constant 0 : i32
    %c0_i32_1 = arith.constant 0 : i32
    return %c0_i32, %c0_i32_0 : i32, i32
  }
  func.func @transform_10(%arg0: i32) -> (i32, i32) {
    %c0_i32 = arith.constant 0 : i32
    %c0_i32_0 = arith.constant 0 : i32
    %c0_i32_1 = arith.constant 0 : i32
    return %c0_i32, %c0_i32_0 : i32, i32
  }
  func.func @transform_11(%arg0: i32) -> (i32, i32) {
    %c0_i32 = arith.constant 0 : i32
    %c0_i32_0 = arith.constant 0 : i32
    %c0_i32_1 = arith.constant 0 : i32
    return %c0_i32, %c0_i32_0 : i32, i32
  }
  func.func @transform_12(%arg0: i32) -> (i32, i32) {
    %c0_i32 = arith.constant 0 : i32
    %c0_i32_0 = arith.constant 0 : i32
    %c0_i32_1 = arith.constant 0 : i32
    return %c0_i32, %c0_i32_0 : i32, i32
  }
  func.func @transform_13(%arg0: i32) -> (i32, i32) {
    %c0_i32 = arith.constant 0 : i32
    %c0_i32_0 = arith.constant 0 : i32
    %c0_i32_1 = arith.constant 0 : i32
    return %c0_i32, %c0_i32_0 : i32, i32
  }
  func.func @transform_14(%arg0: i32) -> (i32, i32, i32) {
    %c0_i32 = arith.constant 0 : i32
    %c0_i32_0 = arith.constant 0 : i32
    %c0_i32_1 = arith.constant 0 : i32
    return %arg0, %c0_i32, %c0_i32_0 : i32, i32, i32
  }
}

</mosaic_0001>

<bundles_post_ra>
// kernel: tpu_custom_call.1
= control target key start
LH: loop header
LB: loop body
LE: loop exit
PB: predicated region body
PF: predicated region fallthrough
CT: control target
= control target key end

     0   :  { %s2618_s0 = inlined_call_operand.hbm [shape: f32[2], index: 0, kind: input, shape index: {}]   ;;  %s2619_s1 = inlined_call_operand.hbm [shape: bf16[2,8,8], index: 1, kind: input, shape index: {}]   ;;  %s2620_s2 = inlined_call_operand.vmem [shape: bf16[2,8,4], index: 2, kind: input, shape index: {}]   ;;  %s2621_s3 = inlined_call_operand.hbm [shape: bf16[4,4], index: 3, kind: input, shape index: {}]   ;;  %s2622_s4 = inlined_call_operand.hbm [shape: f32[1,4], index: 4, kind: input, shape index: {}]   ;;  %s2623_s5 = inlined_call_operand.hbm [shape: bf16[4,32], index: 5, kind: input, shape index: {}]   ;;  %s2624_s6 = inlined_call_operand.hbm [shape: f32[1,32], index: 6, kind: input, shape index: {}]   ;;  %s2625_s7 = inlined_call_operand.hbm [shape: bf16[32,32], index: 7, kind: input, shape index: {}]   ;;  %s2626_s8 = inlined_call_operand.hbm [shape: f32[1,32], index: 8, kind: input, shape index: {}]   ;;  %s2627_s9 = inlined_call_operand.hbm [shape: bf16[32,32], index: 9, kind: input, shape index: {}]   ;;  %s2628_s10 = inlined_call_operand.hbm [shape: f32[1,32], index: 10, kind: input, shape index: {}]   ;;  %s2629_s11 = inlined_call_operand.vmem [shape: f32[32,128], index: 11, kind: input, shape index: {}]   ;;  %s2630_s12 = inlined_call_operand.hbm [shape: f32[32,128], index: 12, kind: input, shape index: {}]   ;;  %s2631_s13 = inlined_call_operand.vmem [shape: f32[1,128], index: 13, kind: input, shape index: {}]   ;;  %s2632_s14 = inlined_call_operand.hbm [shape: f32[2,1,128], index: 14, kind: output, shape index: {}]  }
   0x1   :  { %2638 = sst [smem:[#allocation30_spill]] %s2618_s0 }
   0x2   :  { %2639 = sst [smem:[#allocation31_spill]] %s2621_s3 }
   0x3   :  { %2640 = sst [smem:[#allocation32_spill]] %s2622_s4 }
   0x4   :  { %2641 = sst [smem:[#allocation33_spill]] %s2623_s5 }
   0x5   :  { %2642 = sst [smem:[#allocation34_spill]] %s2624_s6 }
   0x6   :  { %2643 = sst [smem:[#allocation35_spill]] %s2625_s7 }
   0x7   :  { %2644 = sst [smem:[#allocation36_spill]] %s2626_s8 }
   0x8   :  { %2645 = sst [smem:[#allocation37_spill]] %s2631_s13 }
   0x9   :  { %2646 = sst [smem:[#allocation38_spill]] %s2632_s14 }
   0xa   :  { %19 = vsyncpa [#allocation5], 0 }
   0xb   :  { %20 = vsyncpa [#allocation3], 0 }
   0xc   :  { %22 = vsyncpa [#allocation3 + $0x1], 0 }
   0xd   :  { %23 = vsyncpa [#allocation8], 0 }
   0xe   :  { %24 = vsyncpa [#allocation11], 0 }
   0xf   :  { %25 = vsyncpa [#allocation14], 0 }
  0x10   :  { %26 = vsyncpa [#allocation17], 0 }
  0x11   :  { %27 = vsyncpa [#allocation20], 0 }
  0x12   :  { %28 = vsyncpa [#allocation4], 0 }
  0x13   :  { %30 = vsyncpa [#allocation4 + $0x1], 0  ;;  %s2213_s29 = smov 0   ;;  %s2215_s30 = smov 0  }
  0x14   :  { %s2217_s15 = smov 0   ;;  %s2219_s16 = smov 0  }
  0x15 LB: > { %s2120_s17 = smov [#allocation7]   ;;  %s2234_s19 = sadd.s32 4294967295, %s2118_s16   ;;  %s2118_s16 = sphi %s2219_s16, %s2685_s16   ;;  %s2114_s15 = sphi %s2217_s15, %s2684_s15   ;;  %s2110_s30 = sphi %s2215_s30, %s2683_s30   ;;  %s2106_s29 = sphi %s2213_s29, %s2682_s29  }
  0x16   : > { %s393_s18 = sshll.u32 %s2120_s17, 4  ;;  %p1485_p0 = scmp.ge.s32.totalorder %s2118_s16, 1  ;;  %s394_s18 = int_to_ptr.vmem [resolvable:$true] %s393_s18 }
  0x17   : > { %p2633_p1 = scmp.eq.s32.totalorder %s2234_s19, 0  ;;  %p371_p2 = scmp.lt.s32.totalorder %s2118_s16, 3 }
  0x18   : > { %s2121_s21 = smov [#allocation10]   ;;  %s2122_s23 = smov [#allocation13]  }
  0x19   : > { %p2239_p3 = pnand %p1485_p0, %p371_p2  ;;  %s415_s22 = sshll.u32 %s2121_s21, 4  ;;  %s416_s22 = int_to_ptr.vmem [resolvable:$true] %s415_s22 }
  0x1a   : > { %s436_s24 = sshll.u32 %s2122_s23, 4  ;;  %s1768_s27 = scalar_lea.vmem %s394_s18, 32  ;;  %s2252_s24 = int_to_ptr.vmem [resolvable:$true] %s436_s24 }
  0x1b   : > { %s2647_s20 = scalar_select %p2239_p3, 1, 0 }
  0x1c   : > { %p1644_p5 = pneg %p2239_p3  ;;  %p1769_p8 = scmp.ne.s32.totalorder %s394_s18, %s1768_s27 }
  0x1d   : > { %p1776_p11 = scmp.lt.s32.totalorder %s394_s18, %s394_s18  ;;  %p1777_p12 = scmp.lt.s32.totalorder %s1768_s27, %s1768_s27 }
  0x1e   : > { %p2248_p6 = pnand %p1644_p5, %p2633_p1 }
  0x1f   : > { %p1778_p13 = por %p1777_p12, %p1776_p11 }
  0x20   : > { %p2256_p7 = pneg %p2248_p6 }
  0x22   : > { %p1771_p9 = pnand %p1769_p8, %p2256_p7 }
  0x24   : > { %p1772_p10 = pneg %p1771_p9 }
  0x26   : > { %p1779_p0 = pnand %p1778_p13, %p1772_p10 }
  0x28   : > { %1782 = shalt.err (!%p1779_p0)
}
  0x29   : > { %s2650_s3 = sld [smem:[#allocation31_spill]]  ;;  %s1794_s21 = scalar_lea.vmem %s416_s22, 32 }
  0x2a   : > { %p1795_p2 = scmp.ne.s32.totalorder %s416_s22, %s1794_s21  ;;  %p1802_p1 = scmp.lt.s32.totalorder %s416_s22, %s416_s22 }
  0x2b   : > { %p1803_p8 = scmp.lt.s32.totalorder %s1794_s21, %s1794_s21 }
  0x2c   : > { %p1797_p5 = pnand %p1795_p2, %p2256_p7 }
  0x2d   : > { %p1804_p9 = por %p1803_p8, %p1802_p1 }
  0x2e   : > { %p1798_p4 = pneg %p1797_p5 }
  0x2f   : > { %1650 = dma.hbm_to_vmem [thread:$0]  (!%p2248_p6), %s2650_s3, 32, %s394_s18, [#allocation8]  }
  0x30   : > { %p1805_p3 = pnand %p1804_p9, %p1798_p4 }
  0x32   : > { %1808 = shalt.err (!%p1805_p3)
}
  0x33   : > { %s2651_s5 = sld [smem:[#allocation33_spill]]  ;;  %s1820_s18 = scalar_lea.vmem %s2252_s24, 256 }
  0x34   : > { %p1821_p10 = scmp.ne.s32.totalorder %s2252_s24, %s1820_s18  ;;  %p1828_p13 = scmp.lt.s32.totalorder %s2252_s24, %s2252_s24 }
  0x35   : > { %p1829_p1 = scmp.lt.s32.totalorder %s1820_s18, %s1820_s18 }
  0x36   : > { %p1823_p11 = pnand %p1821_p10, %p2256_p7 }
  0x37   : > { %p1830_p4 = por %p1829_p1, %p1828_p13 }
  0x38   : > { %p1824_p12 = pneg %p1823_p11 }
  0x39   : > { %1656 = dma.hbm_to_vmem [thread:$0]  (!%p2248_p6), %s2651_s5, 32, %s416_s22, [#allocation11]  }
  0x3a   : > { %p1831_p3 = pnand %p1830_p4, %p1824_p12 }
  0x3c   : > { %1834 = shalt.err (!%p1831_p3)
}
  0x3d   : > { %s2123_s28 = smov 64   ;;  %s2124_s17 = smov 4  }
  0x3e   : > { %s2652_s7 = sld [smem:[#allocation35_spill]]  ;;  %s2125_s22 = smov [#allocation16]  }
  0x3f   : > { %s460_s27 = sshll.u32 %s2125_s22, 4  ;;  %s461_s27 = int_to_ptr.vmem [resolvable:$true] %s460_s27 }
  0x40   : > { %s1846_s3 = scalar_lea.vmem %s461_s27, 256  ;;  %p1854_p8 = scmp.lt.s32.totalorder %s461_s27, %s461_s27 }
  0x41   : > { %p1847_p0 = scmp.ne.s32.totalorder %s461_s27, %s1846_s3  ;;  %p1855_p9 = scmp.lt.s32.totalorder %s1846_s3, %s1846_s3 }
  0x43   : > { %p1849_p2 = pnand %p1847_p0, %p2256_p7  ;;  %p1856_p10 = por %p1855_p9, %p1854_p8 }
  0x44   : > { %1662 = dma.hbm_to_vmem [thread:$0]  (!%p2248_p6), %s2652_s7, 256, %s2252_s24, [#allocation14], %s2123_s28, %s2123_s28, %s2124_s17  }
  0x45   : > { %p1850_p5 = pneg %p1849_p2 }
  0x47   : > { %p1857_p11 = pnand %p1856_p10, %p1850_p5 }
  0x49   : > { %1860 = shalt.err (!%p1857_p11)
}
  0x4a   : > { %1668 = dma.hbm_to_vmem [thread:$0]  (!%p2248_p6), %s2627_s9, 256, %s461_s27, [#allocation17], %s2123_s28, %s2123_s28, %s2124_s17  }
  0x4b   : > { %s2126_s24 = smov [#allocation2]   ;;  %s2653_s0 = sld [smem:[#allocation30_spill]] }
  0x4c   : > { %s2127_s22 = smov [#allocation9]   ;;  %s2128_s3 = smov [#allocation12]  }
  0x4d   : > { %s404_s7 = sshll.u32 %s2127_s22, 4  ;;  %s426_s14 = sshll.u32 %s2128_s3, 4  ;;  %s405_s7 = int_to_ptr.vmem [resolvable:$true] %s404_s7  ;;  %s427_s14 = int_to_ptr.vmem [resolvable:$true] %s426_s14 }
  0x4e   : > { %s1883_s13 = scalar_lea.vmem %s405_s7, 16  ;;  %s1890_s5 = scalar_lea.vmem %s405_s7, 32 }
  0x4f   : > { %p1884_p12 = scmp.ne.s32.totalorder %s405_s7, %s1883_s13  ;;  %p1891_p4 = scmp.lt.s32.totalorder %s405_s7, %s405_s7 }
  0x50   : > { %p1892_p3 = scmp.lt.s32.totalorder %s1890_s5, %s1883_s13 }
  0x51   : > { %1647 = dma.hbm_to_smem (!%p2248_p6), %s2653_s0, 16, %s2126_s24, [#allocation5]  }
  0x52   : > { %p1886_p13 = pnand %p1884_p12, %p2256_p7  ;;  %p1893_p0 = por %p1892_p3, %p1891_p4 }
  0x54   : > { %p1887_p1 = pneg %p1886_p13 }
  0x56   : > { %p1894_p2 = pnand %p1893_p0, %p1887_p1 }
  0x58   : > { %1897 = shalt.err (!%p1894_p2)
}
  0x59   : > { %s2654_s4 = sld [smem:[#allocation32_spill]]  ;;  %s1909_s27 = scalar_lea.vmem %s427_s14, 16 }
  0x5a   : > { %p1910_p5 = scmp.ne.s32.totalorder %s427_s14, %s1909_s27  ;;  %s1916_s18 = scalar_lea.vmem %s427_s14, 32 }
  0x5b   : > { %p1917_p10 = scmp.lt.s32.totalorder %s427_s14, %s427_s14  ;;  %p1918_p11 = scmp.lt.s32.totalorder %s1916_s18, %s1909_s27 }
  0x5c   : > { %p1912_p8 = pnand %p1910_p5, %p2256_p7 }
  0x5d   : > { %p1919_p12 = por %p1918_p11, %p1917_p10 }
  0x5e   : > { %p1913_p9 = pneg %p1912_p8 }
  0x5f   : > { %1653 = dma.hbm_to_vmem [thread:$0]  (!%p2248_p6), %s2654_s4, 16, %s405_s7, [#allocation8]  }
  0x60   : > { %p1920_p13 = pnand %p1919_p12, %p1913_p9 }
  0x62   : > { %1923 = shalt.err (!%p1920_p13)
}
  0x63   : > { %s2655_s6 = sld [smem:[#allocation34_spill]]  ;;  %s2129_s7 = smov [#allocation15]  }
  0x64   : > { %s450_s21 = sshll.u32 %s2129_s7, 4  ;;  %s2130_s23 = smov [#allocation18]   ;;  %s451_s21 = int_to_ptr.vmem [resolvable:$true] %s450_s21 }
  0x65   : > { %s474_s22 = sshll.u32 %s2130_s23, 4  ;;  %s1935_s3 = scalar_lea.vmem %s451_s21, 16  ;;  %s475_s22 = int_to_ptr.vmem [resolvable:$true] %s474_s22 }
  0x66   : > { %p1936_p1 = scmp.ne.s32.totalorder %s451_s21, %s1935_s3  ;;  %s1942_s5 = scalar_lea.vmem %s451_s21, 32 }
  0x67   : > { %p1943_p0 = scmp.lt.s32.totalorder %s451_s21, %s451_s21  ;;  %p1944_p2 = scmp.lt.s32.totalorder %s1942_s5, %s1935_s3 }
  0x68   : > { %p1938_p4 = pnand %p1936_p1, %p2256_p7 }
  0x69   : > { %1659 = dma.hbm_to_vmem [thread:$0]  (!%p2248_p6), %s2655_s6, 16, %s427_s14, [#allocation11]  }
  0x6a   : > { %p1939_p3 = pneg %p1938_p4  ;;  %p1945_p5 = por %p1944_p2, %p1943_p0 }
  0x6c   : > { %p1946_p8 = pnand %p1945_p5, %p1939_p3 }
  0x6e   : > { %1949 = shalt.err (!%p1946_p8)
}
  0x6f   : > { %s2656_s8 = sld [smem:[#allocation36_spill]]  ;;  %s1961_s17 = scalar_lea.vmem %s475_s22, 16 }
  0x70   : > { %p1962_p9 = scmp.ne.s32.totalorder %s475_s22, %s1961_s17  ;;  %s1968_s27 = scalar_lea.vmem %s475_s22, 32 }
  0x71   : > { %p1969_p12 = scmp.lt.s32.totalorder %s475_s22, %s475_s22  ;;  %p1970_p13 = scmp.lt.s32.totalorder %s1968_s27, %s1961_s17 }
  0x72   : > { %p1964_p10 = pnand %p1962_p9, %p2256_p7 }
  0x73   : > { %p1971_p1 = por %p1970_p13, %p1969_p12 }
  0x74   : > { %p1965_p11 = pneg %p1964_p10 }
  0x75   : > { %1665 = dma.hbm_to_vmem [thread:$0]  (!%p2248_p6), %s2656_s8, 16, %s451_s21, [#allocation14]  }
  0x76   : > { %p1972_p4 = pnand %p1971_p1, %p1965_p11 }
  0x78   : > { %1975 = shalt.err (!%p1972_p4)
}
  0x79   : > { %1671 = dma.hbm_to_vmem [thread:$0]  (!%p2248_p6), %s2628_s10, 16, %s475_s22, [#allocation17]  }
  0x7a   : > { %s2131_s24 = smov [#allocation19]  }
  0x7b   : > { %s487_s7 = sshll.u32 %s2131_s24, 4  ;;  %s488_s7 = int_to_ptr.vmem [resolvable:$true] %s487_s7 }
  0x7c   : > { %s1987_s21 = scalar_lea.vmem %s488_s7, 512  ;;  %p1995_p5 = scmp.lt.s32.totalorder %s488_s7, %s488_s7 }
  0x7d   : > { %p1988_p3 = scmp.ne.s32.totalorder %s488_s7, %s1987_s21  ;;  %p1996_p8 = scmp.lt.s32.totalorder %s1987_s21, %s1987_s21 }
  0x7f   : > { %p1990_p0 = pnand %p1988_p3, %p2256_p7  ;;  %p1997_p9 = por %p1996_p8, %p1995_p5 }
  0x81   : > { %p1991_p2 = pneg %p1990_p0 }
  0x83   : > { %p1998_p10 = pnand %p1997_p9, %p1991_p2 }
  0x85   : > { %2001 = shalt.err (!%p1998_p10)
}
  0x86   : > { %s2132_s23 = smov 128   ;;  %s2133_s26 = smov 8  }
  0x87   : > { %1674 = dma.hbm_to_vmem [thread:$0]  (!%p2248_p6), %s2630_s12, 512, %s488_s7, [#allocation20], %s2132_s23, %s2132_s23, %s2133_s26  }
  0x88   : > { %s1484_s5 = sadd.s32 4294967294, %s2118_s16   ;;  %s2335_s28 = sadd.s32 1, %s2118_s16  }
  0x89   : > { %s61_s14 = ssub.s32 %s2118_s16, %s2335_s28  ;;  %s64_s17 = sadd.s32 1, %s2114_s15 }
  0x8a   : > { %p62_p7 = scmp.eq.s32.totalorder %s61_s14, 0  ;;  %p71_p11 = scmp.ne.s32.totalorder %s2114_s15, %s2110_s30 }
  0x8b   : > { %p72_p12 = scmp.eq.s32.totalorder %s2118_s16, 0  ;;  %p77_p13 = scmp.ne.s32.totalorder %s2110_s30, %s2106_s29 }
  0x8c   : > { %s2346_s27 = scalar_select %p62_p7, %s2114_s15, %s64_s17  }
  0x8d   : > { %p2348_p1 = por %p72_p12, %p71_p11  ;;  %p2658_p4 = scmp.eq.s32.totalorder %s2234_s19, 0 }
  0x8e   : > { %p358_p3 = scmp.eq.s32.totalorder %s2234_s19, 1  ;;  %p364_p0 = scmp.eq.s32.totalorder %s1484_s5, 1 }
  0x8f   : > { %p2354_p6 = por %p2658_p4, %p77_p13  ;;  %p1693_p2 = scmp.lt.s32.totalorder %s2118_s16, 2 }
  0x90   : > { %s504_s13 = sand.u32 1, %s2114_s15   ;;  %p2361_p5 = por %p358_p3, %p71_p11 }
  0x91   : > { %s2659_s18 = scalar_select %p2354_p6, 1, 0 }
  0x92   : > { %s2660_s24 = scalar_select %p2361_p5, 1, 0 }
  0x93   : > { %p2365_p8 = por %p364_p0, %p77_p13  ;;  %s1497_s21 = sshll.u32 %s504_s13, 2 }
  0x94   : > { %s1498_s23 = sshll.u32 %s2118_s16, 6  ;;  %s508_s5 = scalar_lea.vmem [#allocation6], %s1497_s21 }
  0x95   : > { %s2661_s7 = scalar_select %p2365_p8, 1, 0 }
  0x96   : > { %s2373_s3 = scalar_lea.hbm %s2619_s1, %s1498_s23  ;;  %s515_s14 = sshll.u32 %s508_s5, 4  ;;  %s516_s14 = int_to_ptr.vmem [resolvable:$true] %s515_s14 }
  0x97   : > { %p2377_p9 = pnand %p1693_p2, %p2348_p1  ;;  %s505_s0 = scalar_lea.sflag [#allocation3], %s504_s13 }
  0x98   : > { %s2002_s4 = scalar_lea.hbm %s2373_s3, 64  ;;  %s2007_s22 = scalar_lea.hbm %s2619_s1, 128 }
  0x99   : > { %p2003_p10 = scmp.ne.s32.totalorder %s2373_s3, %s2002_s4  ;;  %p2004_p7 = pneg %p2377_p9 }
  0x9a   : > { %p2008_p13 = scmp.lt.s32.totalorder %s2373_s3, %s2619_s1  ;;  %p2009_p1 = scmp.lt.s32.totalorder %s2007_s22, %s2002_s4 }
  0x9b   : > { %p2005_p11 = pnand %p2004_p7, %p2003_p10 }
  0x9c   : > { %p2010_p4 = por %p2009_p1, %p2008_p13 }
  0x9d   : > { %p2006_p12 = pneg %p2005_p11 }
  0x9f   : > { %p2011_p3 = pnand %p2010_p4, %p2006_p12 }
  0xa1   : > { %2014 = shalt.err (!%p2011_p3)
}
  0xa2   : > { %s2015_s25 = scalar_lea.vmem %s516_s14, 64  ;;  %s2134_s13 = smov [#allocation6]  }
  0xa3   : > { %p2016_p0 = scmp.ne.s32.totalorder %s516_s14, %s2015_s25  ;;  %s2020_s6 = sshll.u32 %s2134_s13, 4  ;;  %s2021_s6 = int_to_ptr.vmem [resolvable:$false] %s2020_s6 }
  0xa4   : > { %s2022_s8 = scalar_lea.vmem %s2021_s6, 128  ;;  %p2023_p10 = scmp.lt.s32.totalorder %s516_s14, %s2021_s6 }
  0xa5   : > { %p2018_p2 = pnand %p2016_p0, %p2004_p7  ;;  %p2024_p11 = scmp.lt.s32.totalorder %s2022_s8, %s2015_s25 }
  0xa7   : > { %p2019_p8 = pneg %p2018_p2  ;;  %p2025_p5 = por %p2024_p11, %p2023_p10 }
  0xa9   : > { %p2026_p6 = pnand %p2025_p5, %p2019_p8 }
  0xab   : > { %2029 = shalt.err (!%p2026_p6)
}
  0xac   : > { %1678 = dma.hbm_to_vmem [thread:$0]  (!%p2377_p9), %s2373_s3, 64, %s516_s14, %s505_s0  }
  0xad   : > { %p2663_p12 = scmp.ne.s32.totalorder %s2647_s20, 0 }
  0xae   : > { %p2664_p13 = scmp.eq.s32.totalorder (!%p2663_p12), %s2234_s19, 0 }
  0xaf   : > { %531 = sbr.rel (%p2663_p12) target bundleno = 1402 (0x57a), region = 76 }
  0xb4   : > { %2073 = dma.done.wait (%p2664_p13), [#allocation5], 16   ;;  %p2665_p7 = pmov %p2664_p13 }
  0xb5   : > { %s2402_s4 = sand.u32 1, %s2110_s30   ;;  %p2666_p6 = scmp.ne.s32.totalorder %s2659_s18, 0 }
  0xb6   : > { %2075 = vsyncadd (%p2665_p7), [#allocation5], 4294967280  ;;  %s1501_s6 = sshll.u32 %s2402_s4, 2  ;;  %s538_s8 = scalar_lea.sflag [#allocation3], %s2402_s4 }
  0xb7   : > { %s541_s17 = scalar_lea.vmem [#allocation6], %s1501_s6 }
  0xb8   : > { %2077 = dma.done.wait (%p2666_p6), %s538_s8, 64  }
  0xb9   : > { %2079 = vsyncadd (%p2666_p6), %s538_s8, 4294967232  ;;  %p2667_p5 = pmov %p2665_p7 }
  0xbb   : > { %2081 = dma.done.wait (%p2667_p5), [#allocation8], 48   ;;  %p2668_p8 = pmov %p2667_p5 }
  0xbc   : > { %p2669_p9 = pmov %p2667_p5 }
  0xbd   : > { %2083 = vsyncadd (%p2668_p8), [#allocation8], 4294967248 }
  0xbe   : > { %2085 = dma.done.wait (%p2669_p9), [#allocation11], 48   ;;  %p2670_p1 = pmov %p2667_p5 }
  0xc0   : > { %2087 = vsyncadd (%p2670_p1), [#allocation11], 4294967248  ;;  %p2671_p4 = pmov %p2670_p1 }
  0xc1   : > { %p2672_p3 = pmov %p2670_p1 }
  0xc2   : > { %2089 = dma.done.wait (%p2671_p4), [#allocation14], 272  }
  0xc3   : > { %2091 = vsyncadd (%p2672_p3), [#allocation14], 4294967024  ;;  %p2673_p0 = pmov %p2670_p1 }
  0xc5   : > { %2093 = dma.done.wait (%p2673_p0), [#allocation17], 272   ;;  %p2674_p2 = pmov %p2673_p0 }
  0xc6   : > { %p2675_p10 = pmov %p2673_p0 }
  0xc7   : > { %2095 = vsyncadd (%p2674_p2), [#allocation17], 4294967024 }
  0xc8   : > { %2097 = dma.done.wait (%p2675_p10), [#allocation20], 512   ;;  %p2676_p11 = pmov %p2673_p0 }
  0xca   : > { %2099 = vsyncadd (%p2676_p11), [#allocation20], 4294966784 }
  0xcb   : > { %582 = sfence }
  0xcc   : > { %v631_v0 = vld [vmem:[%s541_s17] sm:$0xf]  ;;  %v633_v1 = vlaneseq  ;;  %v785_v20 = vld [vmem:[#allocation7] sm:$0x3]  ;;  %vm796_vm0 = vcmask 1041408   ;;  %v2135_v21 = vmov 0.0  }
  0xcd   : > { %v632_v2 = vunpack.c.l.bf16 %v631_v0  ;;  %1550 = vmatprep.subr.bf16.mxu0 %v2135_v21  ;;  %v798_v22 = vsel %vm796_vm0, %v785_v20, 0  ;;  %1556 = vmatprep.subr.bf16.mxu1 %v2135_v21  ;;  %vm2136_vm1 = vmmov 0   ;;  %p626_p12 = scmp.lt.s32.totalorder %s2234_s19, 1  ;;  %vm703_vm2 = vcmask 31744   ;;  %s2475_s23 = sld [smem:[#allocation2]] }
  0xce   : > { %v634_v3 = vshrl.u32 %v633_v1, 7  ;;  %1551 = vmatpush3.bf16.msra.mxu0 %v798_v22  ;;  %1552 = vmatprep.mubr.msk.bf16.mxu0 %vm2136_vm1, %v2135_v21  ;;  %vm768_vm3 = vcmask 1041409   ;;  %vm770_vm4 = vcmask 1042434   ;;  %vm772_vm5 = vcmask 1043459   ;;  %s2536_s22 = sld [smem:[#allocation2 + $0x1]]  ;;  %s1296_s6 = scalar_lea.sflag [#allocation4], %s2402_s4 }
  0xcf   : > { %1558 = vmatprep.mubr.msk.bf16.mxu1 %vm2136_vm1, %v2135_v21  ;;  %1562 = vmatprep.subr.bf16.mxu0 %v2135_v21  ;;  %s627_s0 = scalar_select %p626_p12, %s2234_s19, 1  ;;  %vm774_vm6 = vcmask 1044484   ;;  %vm776_vm7 = vcmask 1045509   ;;  %vm778_vm8 = vcmask 1046534   ;;  %vm780_vm9 = vcmask 1047559  }
  0xd0   : > { %v649_v4 = vsub.s32 2, %v634_v3  ;;  %v635_v5 = vsub.s32 0, %v634_v3  ;;  %v656_v6 = vsub.s32 3, %v634_v3  ;;  %v642_v7 = vsub.s32 1, %v634_v3  ;;  %s2678_s25 = sld [smem:[#allocation38_spill]]  ;;  %p2679_p7 = scmp.ne.s32.totalorder %s2660_s24, 0 }
  0xd1   : > { %v670_v12 = vsub.s32 5, %v634_v3  ;;  %v663_v13 = vsub.s32 4, %v634_v3  ;;  %v684_v16 = vsub.s32 7, %v634_v3  ;;  %v677_v17 = vsub.s32 6, %v634_v3  ;;  %s1511_s20 = sshll.u32 %s627_s0, 2  ;;  %s2137_s17 = smov [#allocation21]  }
  0xd2   : > { %v650_v8 = vrot.slane %v632_v2, %v649_v4  ;;  %v636_v9 = vrot.slane %v632_v2, %v635_v5  ;;  %v657_v10 = vrot.slane %v632_v2, %v656_v6  ;;  %v643_v11 = vrot.slane %v632_v2, %v642_v7  ;;  %s629_s14 = scalar_lea.vmem %s2620_s2, %s1511_s20  ;;  %s2034_s0 = sshll.u32 %s2137_s17, 4  ;;  %s2035_s0 = int_to_ptr.vmem [resolvable:$false] %s2034_s0 }
  0xd3   : > { %v671_v14 = vrot.slane %v632_v2, %v670_v12  ;;  %v664_v15 = vrot.slane %v632_v2, %v663_v13  ;;  %v685_v18 = vrot.slane %v632_v2, %v684_v16  ;;  %v678_v19 = vrot.slane %v632_v2, %v677_v17  ;;  %v689_v23 = vld [vmem:[%s629_s14] sm:$0xf]  ;;  %s692_s26 = sadd.f32 1.0, %s2475_s23  ;;  %s1527_s23 = sshll.u32 %s2234_s19, 4 }
  0xd4   : > { %652 = vbcast.lane.b32.xlu1 %v650_v8, 256  ;;  %638 = vbcast.lane.b32.xlu0 %v636_v9, 256  ;;  %v2443_v24 = vunpack.c.l.bf16 %v689_v23  ;;  %vm909_vm12 = vcmask 261120   ;;  %s967_s21 = sadd.f32 1.0, %s2536_s22  ;;  %s2036_s19 = scalar_lea.vmem %s2035_s0, 32 }
  0xd5   : > { %s2677_s14 = sld [smem:[#allocation37_spill]] }
  0xd6   : > { %s1306_s13 = scalar_lea.hbm %s2678_s25, %s1527_s23 }
  0xd8   : > { %659 = vbcast.lane.b32.xlu1 %v657_v10, 256  ;;  %645 = vbcast.lane.b32.xlu0 %v643_v11, 256 }
  0xdc   : > { %673 = vbcast.lane.b32.xlu1 %v671_v14, 256  ;;  %666 = vbcast.lane.b32.xlu0 %v664_v15, 256 }
  0xe0   : > { %687 = vbcast.lane.b32.xlu1 %v685_v18, 256  ;;  %680 = vbcast.lane.b32.xlu0 %v678_v19, 256 }
 0x146   : > { %v2445_v25 = vpop.permute.xlu1 %652  ;;  %v2447_v26 = vpop.permute.xlu0 %638 }
 0x147   : > { %v697_v27 = vmul.f32 %v2443_v24, %v2445_v25  ;;  %v695_v28 = vmul.f32 %v2443_v24, %v2447_v26 }
 0x149   : > { %v718_v29 = vsel %vm703_vm2, %v697_v27, 0.0  ;;  %v704_v30 = vsel %vm703_vm2, %v695_v28, 0.0 }
 0x14a   : > { %v719_v31 = vrot.slane %v718_v29, 4  ;;  %v705_v32 = vrot.slane %v704_v30, 4  ;;  %v2455_v33 = vpop.permute.xlu1 %659  ;;  %v2457_v34 = vpop.permute.xlu0 %645 }
 0x14b   : > { %v698_v35 = vmul.f32 %v2443_v24, %v2455_v33  ;;  %v696_v36 = vmul.f32 %v2443_v24, %v2457_v34 }
 0x14c   : > { %v720_v37 = vadd.f32 %v719_v31, %v718_v29  ;;  %v706_v38 = vadd.f32 %v705_v32, %v704_v30 }
 0x14d   : > { %v725_v39 = vsel %vm703_vm2, %v698_v35, 0.0  ;;  %v711_v40 = vsel %vm703_vm2, %v696_v36, 0.0 }
 0x14e   : > { %v721_v41 = vrot.slane %v720_v37, 2  ;;  %v707_v42 = vrot.slane %v706_v38, 2  ;;  %v726_v43 = vrot.slane %v725_v39, 4  ;;  %v712_v44 = vrot.slane %v711_v40, 4  ;;  %v2465_v45 = vpop.permute.xlu1 %673  ;;  %v2467_v46 = vpop.permute.xlu0 %666 }
 0x14f   : > { %v700_v47 = vmul.f32 %v2443_v24, %v2465_v45  ;;  %v699_v48 = vmul.f32 %v2443_v24, %v2467_v46 }
 0x150   : > { %v722_v49 = vadd.f32 %v721_v41, %v720_v37  ;;  %v708_v50 = vadd.f32 %v707_v42, %v706_v38  ;;  %v727_v51 = vadd.f32 %v726_v43, %v725_v39  ;;  %v713_v52 = vadd.f32 %v712_v44, %v711_v40 }
 0x151   : > { %v739_v53 = vsel %vm703_vm2, %v700_v47, 0.0  ;;  %v732_v54 = vsel %vm703_vm2, %v699_v48, 0.0  ;;  %v693_v38 = vstv %s692_s26  ;;  %s625_s26 = scalar_lea.vmem [#allocation21], %s2402_s4 }
 0x152   : > { %v728_v55 = vrot.slane %v727_v51, 2  ;;  %v714_v56 = vrot.slane %v713_v52, 2  ;;  %v2477_v57 = vpop.permute.xlu1 %687  ;;  %v2479_v58 = vpop.permute.xlu0 %680  ;;  %v740_v59 = vrot.slane %v739_v53, 4  ;;  %v733_v60 = vrot.slane %v732_v54, 4  ;;  %s1308_s22 = sshll.u32 %s625_s26, 4  ;;  %s1309_s22 = int_to_ptr.vmem [resolvable:$true] %s1308_s22 }
 0x153   : > { %v702_v61 = vmul.f32 %v2443_v24, %v2477_v57  ;;  %v701_v62 = vmul.f32 %v2443_v24, %v2479_v58  ;;  %v723_v63 = vrot.slane %v722_v49, 1  ;;  %v709_v0 = vrot.slane %v708_v50, 1  ;;  %s2030_s8 = scalar_lea.vmem %s1309_s22, 16  ;;  %p2037_p8 = scmp.lt.s32.totalorder %s1309_s22, %s2035_s0 }
 0x154   : > { %v729_v1 = vadd.f32 %v728_v55, %v727_v51  ;;  %v715_v2 = vadd.f32 %v714_v56, %v713_v52  ;;  %v741_v3 = vadd.f32 %v740_v59, %v739_v53  ;;  %v734_v4 = vadd.f32 %v733_v60, %v732_v54  ;;  %v844_v52 = vld [vmem:[#allocation10] sm:$0x3]  ;;  %p2031_p13 = scmp.ne.s32.totalorder %s1309_s22, %s2030_s8  ;;  %p2038_p9 = scmp.lt.s32.totalorder %s2036_s19, %s2030_s8 }
 0x155   : > { %v753_v5 = vsel %vm703_vm2, %v702_v61, 0.0  ;;  %v746_v6 = vsel %vm703_vm2, %v701_v62, 0.0  ;;  %v710_v13 = vadd.f32 %v709_v0, %v708_v50  ;;  %v724_v17 = vadd.f32 %v723_v63, %v722_v49  ;;  %v1753_v0 = vld [vmem:[#allocation13 + $0x8] sm:$0xff]  }
 0x156   : > { %v730_v7 = vrot.slane %v729_v1, 1  ;;  %v716_v8 = vrot.slane %v715_v2, 1  ;;  %v754_v9 = vrot.slane %v753_v5, 4  ;;  %v747_v10 = vrot.slane %v746_v6, 4  ;;  %p2032_p6 = pnand %p2031_p13, %p2679_p7  ;;  %p2039_p1 = por %p2038_p9, %p2037_p8 }
 0x157   : > { %v742_v11 = vrot.slane %v741_v3, 2  ;;  %v735_v12 = vrot.slane %v734_v4, 2  ;;  %v694_v44 = vmul.f32 %v693_v38, %v2443_v24  ;;  %v856_v53 = vsel %vm796_vm0, %v844_v52, 0  ;;  %v1512_v24 = vld [vmem:[#allocation9] ss:$0 sm:$0xff] }
 0x158   : > { %v717_v14 = vadd.f32 %v716_v8, %v715_v2  ;;  %v755_v15 = vadd.f32 %v754_v9, %v753_v5  ;;  %v748_v16 = vadd.f32 %v747_v10, %v746_v6  ;;  %v731_v20 = vadd.f32 %v730_v7, %v729_v1  ;;  %1557 = vmatpush3.bf16.msra.mxu1 %v856_v53  ;;  %v1754_v1 = vld [vmem:[#allocation13] sm:$0xff]   ;;  %v1514_v2 = vld [vmem:[#allocation12] ss:$0 sm:$0xff]  ;;  %p2033_p5 = pneg %p2032_p6 }
 0x159   : > { %v743_v18 = vadd.f32 %v742_v11, %v741_v3  ;;  %v736_v19 = vadd.f32 %v735_v12, %v734_v4  ;;  %1570 = vmatprep.subr.bf16.mxu1 %v2135_v21 }
 0x15a   : > { %v769_v22 = vsel %vm768_vm3, %v717_v14, %v710_v13  ;;  %v756_v23 = vrot.slane %v755_v15, 2  ;;  %v749_v27 = vrot.slane %v748_v16, 2  ;;  %p2040_p4 = pnand %p2039_p1, %p2033_p5 }
 0x15b   : > { %v771_v28 = vsel %vm770_vm4, %v724_v17, %v769_v22  ;;  %v744_v29 = vrot.slane %v743_v18, 1  ;;  %v737_v30 = vrot.slane %v736_v19, 1 }
 0x15c   : > { %v773_v31 = vsel %vm772_vm5, %v731_v20, %v771_v28  ;;  %v757_v32 = vadd.f32 %v756_v23, %v755_v15  ;;  %v750_v35 = vadd.f32 %v749_v27, %v748_v16 }
 0x15d   : > { %v745_v36 = vadd.f32 %v744_v29, %v743_v18  ;;  %v738_v37 = vadd.f32 %v737_v30, %v736_v19 }
 0x15e   : > { %v758_v39 = vrot.slane %v757_v32, 1  ;;  %v751_v40 = vrot.slane %v750_v35, 1 }
 0x15f   : > { %v775_v41 = vsel %vm774_vm6, %v738_v37, %v773_v31 }
 0x160   : > { %v759_v42 = vadd.f32 %v758_v39, %v757_v32  ;;  %v752_v43 = vadd.f32 %v751_v40, %v750_v35  ;;  %v777_v47 = vsel %vm776_vm7, %v745_v36, %v775_v41 }
 0x162   : > { %v779_v48 = vsel %vm778_vm8, %v752_v43, %v777_v47 }
 0x163   : > { %v781_v49 = vsel %vm780_vm9, %v759_v42, %v779_v48 }
 0x164   : > { %v783_v50 = vadd.f32 %v781_v49, %v694_v44 }
 0x166   : > { %v784_v51 = vpack.c.bf16 %v783_v50, %v783_v50 }
 0x168   : > { %1553 = vmatmul.mubr.msk.bf16.vlgmr.msra.gmra.mxu0 %vm703_vm2, %v784_v51 }
 0x169   : > { %1566 = vmatprep.mubr.msk.bf16.mxu0 %vm2136_vm1, %v2135_v21  ;;  %1563 = vmatpush3.bf16.msra.mxu0 %v1753_v0 }
 0x16a   : > { %1564 = vmatprep.subr.bf16.mxu0 %v2135_v21 }
 0x16d   : > { %1565 = vmatpush3.bf16.msra.mxu0 %v1754_v1 }
 0x16e   : > { %1578 = vmatprep.subr.mxu0 %v2135_v21 }
 0x228   : > { %v834_v54 = vpop.f32.mrf.mxu0 }
 0x229   : > { %v835_v55 = vadd.f32 %v1512_v24, %v834_v54 }
 0x22a   : > { %v1554_v56 = vpop.f32.mrf.mxu0 }
 0x22b   : > { %vm840_vm10 = vcmp.ge.f32.partialorder %v835_v55, 0.0  ;;  %v841_v59 = vmul.f32 0.01, %v835_v55 }
 0x22c   : > { %v837_v60 = vpop.f32.mrf.mxu0 }
 0x22d   : > { %v842_v61 = vsel %vm840_vm10, %v835_v55, %v841_v59 }
 0x22e   : > { %v843_v62 = vpack.c.bf16 %v842_v61, %v842_v61  ;;  %v1555_v63 = vpop.f32.mrf.mxu0 }
 0x230   : > { %1559 = vmatmul.mubr.msk.bf16.vlgmr.msra.gmra.mxu1 %vm703_vm2, %v843_v62 }
 0x231   : > { %1574 = vmatprep.mubr.msk.bf16.mxu1 %vm2136_vm1, %v2135_v21 }
 0x2f0   : > { %v892_v3 = vpop.f32.mrf.mxu1 }
 0x2f1   : > { %v2506_v4 = vadd.f32 %v1514_v2, %v892_v3 }
 0x2f2   : > { %v1560_v5 = vpop.f32.mrf.mxu1 }
 0x2f3   : > { %vm898_vm11 = vcmp.ge.f32.partialorder %v2506_v4, 0.0  ;;  %v899_v6 = vmul.f32 0.01, %v2506_v4 }
 0x2f4   : > { %v895_v7 = vpop.f32.mrf.mxu1 }
 0x2f5   : > { %v2511_v8 = vsel %vm898_vm11, %v2506_v4, %v899_v6 }
 0x2f6   : > { %v901_v9 = vmul.f32 %v2511_v8, %v2447_v26  ;;  %v902_v10 = vmul.f32 %v2511_v8, %v2457_v34  ;;  %v903_v11 = vmul.f32 %v2511_v8, %v2445_v25  ;;  %v904_v12 = vmul.f32 %v2511_v8, %v2455_v33  ;;  %v1561_v13 = vpop.f32.mrf.mxu1 }
 0x2f7   : > { %v905_v14 = vmul.f32 %v2511_v8, %v2467_v46  ;;  %v906_v15 = vmul.f32 %v2511_v8, %v2465_v45  ;;  %v907_v26 = vmul.f32 %v2511_v8, %v2479_v58  ;;  %v908_v28 = vmul.f32 %v2511_v8, %v2477_v57 }
 0x2f8   : > { %v910_v16 = vsel %vm909_vm12, %v901_v9, 0.0  ;;  %v917_v34 = vsel %vm909_vm12, %v902_v10, 0.0  ;;  %v924_v25 = vsel %vm909_vm12, %v903_v11, 0.0  ;;  %v931_v17 = vsel %vm909_vm12, %v904_v12, 0.0 }
 0x2f9   : > { %v911_v33 = vrot.slane %v910_v16, 4  ;;  %v918_v18 = vrot.slane %v917_v34, 4  ;;  %v925_v19 = vrot.slane %v924_v25, 4  ;;  %v932_v20 = vrot.slane %v931_v17, 4 }
 0x2fa   : > { %v938_v46 = vsel %vm909_vm12, %v905_v14, 0.0  ;;  %v945_v45 = vsel %vm909_vm12, %v906_v15, 0.0  ;;  %v952_v31 = vsel %vm909_vm12, %v907_v26, 0.0  ;;  %v959_v49 = vsel %vm909_vm12, %v908_v28, 0.0 }
 0x2fb   : > { %v912_v22 = vadd.f32 %v911_v33, %v910_v16  ;;  %v919_v23 = vadd.f32 %v918_v18, %v917_v34  ;;  %v926_v27 = vadd.f32 %v925_v19, %v924_v25  ;;  %v933_v58 = vadd.f32 %v932_v20, %v931_v17  ;;  %v1755_v20 = vld [vmem:[#allocation16 + $0x8] sm:$0xff]  }
 0x2fc   : > { %v939_v29 = vrot.slane %v938_v46, 4  ;;  %v946_v30 = vrot.slane %v945_v45, 4  ;;  %v953_v40 = vrot.slane %v952_v31, 4  ;;  %v960_v56 = vrot.slane %v959_v49, 4  ;;  %1571 = vmatpush3.bf16.msra.mxu1 %v1755_v20 }
 0x2fd   : > { %v913_v32 = vrot.slane %v912_v22, 2  ;;  %v920_v35 = vrot.slane %v919_v23, 2  ;;  %v927_v36 = vrot.slane %v926_v27, 2  ;;  %v934_v37 = vrot.slane %v933_v58, 2  ;;  %1572 = vmatprep.subr.bf16.mxu1 %v2135_v21 }
 0x2fe   : > { %v940_v38 = vadd.f32 %v939_v29, %v938_v46  ;;  %v947_v39 = vadd.f32 %v946_v30, %v945_v45  ;;  %v954_v57 = vadd.f32 %v953_v40, %v952_v31  ;;  %v961_v1 = vadd.f32 %v960_v56, %v959_v49  ;;  %v1756_v46 = vld [vmem:[#allocation16] sm:$0xff]  }
 0x2ff   : > { %v914_v41 = vadd.f32 %v913_v32, %v912_v22  ;;  %v921_v42 = vadd.f32 %v920_v35, %v919_v23  ;;  %v928_v43 = vadd.f32 %v927_v36, %v926_v27  ;;  %v935_v44 = vadd.f32 %v934_v37, %v933_v58  ;;  %v1517_v23 = vld [vmem:[#allocation15] ss:$0 sm:$0xff]  ;;  %v1139_v40 = vld [vmem:[%s2629_s11 + $0x8] sm:$0xff] }
 0x300   : > { %v941_v47 = vrot.slane %v940_v38, 2  ;;  %v948_v48 = vrot.slane %v947_v39, 2  ;;  %v955_v55 = vrot.slane %v954_v57, 2  ;;  %v962_v6 = vrot.slane %v961_v1, 2  ;;  %1573 = vmatpush3.bf16.msra.mxu1 %v1756_v46 }
 0x301   : > { %v915_v50 = vrot.slane %v914_v41, 1  ;;  %v922_v51 = vrot.slane %v921_v42, 1  ;;  %v929_v52 = vrot.slane %v928_v43, 1  ;;  %v936_v53 = vrot.slane %v935_v44, 1  ;;  %1589 = vmatprep.subr.mxu1 %v2135_v21 }
 0x302   : > { %v942_v24 = vadd.f32 %v941_v47, %v940_v38  ;;  %v949_v54 = vadd.f32 %v948_v48, %v947_v39  ;;  %v956_v0 = vadd.f32 %v955_v55, %v954_v57  ;;  %v963_v11 = vadd.f32 %v962_v6, %v961_v1  ;;  %v1141_v38 = vld [vmem:[%s2629_s11 + $0x18] sm:$0xff]  ;;  %v1521_v57 = vld [vmem:[#allocation18] ss:$0 sm:$0xff] }
 0x303   : > { %v916_v59 = vadd.f32 %v915_v50, %v914_v41  ;;  %v923_v60 = vadd.f32 %v922_v51, %v921_v42  ;;  %v930_v61 = vadd.f32 %v929_v52, %v928_v43  ;;  %v937_v3 = vadd.f32 %v936_v53, %v935_v44  ;;  %v1138_v41 = vld [vmem:[%s2629_s11] sm:$0xff]  ;;  %v1145_v43 = vld [vmem:[#allocation19 + $0x18] sm:$0xff]  ;;  %v1142_v48 = vld [vmem:[#allocation19] sm:$0xff] }
 0x304   : > { %v943_v62 = vrot.slane %v942_v24, 1  ;;  %v950_v63 = vrot.slane %v949_v54, 1  ;;  %v957_v5 = vrot.slane %v956_v0, 1  ;;  %v964_v15 = vrot.slane %v963_v11, 1  ;;  %v1144_v44 = vld [vmem:[#allocation19 + $0x10] sm:$0xff]  ;;  %v1143_v47 = vld [vmem:[#allocation19 + $0x8] sm:$0xff] }
 0x305   : > { %v978_v2 = vsel %vm768_vm3, %v923_v60, %v916_v59  ;;  %v968_v26 = vstv %s967_s21 }
 0x306   : > { %v944_v7 = vadd.f32 %v943_v62, %v942_v24  ;;  %v979_v9 = vsel %vm770_vm4, %v930_v61, %v978_v2  ;;  %v951_v10 = vadd.f32 %v950_v63, %v949_v54  ;;  %v958_v13 = vadd.f32 %v957_v5, %v956_v0  ;;  %v1292_v0 = vld [vmem:[%s2677_s14] sm:$0x1] }
 0x307   : > { %v980_v12 = vsel %vm772_vm5, %v937_v3, %v979_v9  ;;  %v965_v25 = vadd.f32 %v964_v15, %v963_v11  ;;  %v969_v17 = vmul.f32 %v968_v26, %v2511_v8  ;;  %v1124_v8 = vsel %vm909_vm12, %v2506_v4, 0.0  ;;  %v1140_v4 = vld [vmem:[%s2629_s11 + $0x10] sm:$0xff] }
 0x308   : > { %v981_v14 = vsel %vm774_vm6, %v944_v7, %v980_v12  ;;  %v1125_v45 = vrot.slane %v1124_v8, 4 }
 0x309   : > { %v982_v16 = vsel %vm776_vm7, %v951_v10, %v981_v14 }
 0x30a   : > { %v983_v34 = vsel %vm778_vm8, %v958_v13, %v982_v16  ;;  %v1126_v22 = vadd.f32 %v1125_v45, %v1124_v8 }
 0x30b   : > { %v984_v33 = vsel %vm780_vm9, %v965_v25, %v983_v34 }
 0x30c   : > { %v986_v18 = vadd.f32 %v984_v33, %v969_v17  ;;  %v1127_v28 = vrot.slane %v1126_v22, 2 }
 0x30e   : > { %v987_v19 = vpack.c.bf16 %v986_v18, %v986_v18  ;;  %v1128_v35 = vadd.f32 %v1127_v28, %v1126_v22 }
 0x310   : > { %1567 = vmatmul.mubr.msk.bf16.vlgmr.msra.gmra.mxu0 %vm909_vm12, %v987_v19  ;;  %v1129_v39 = vrot.slane %v1128_v35, 1 }
 0x311   : > { %1586 = vmatprep.mubr.msk.f32.mxu0 %vm2136_vm1, %v2135_v21  ;;  %1579 = vmatpush3.msra.mxu0 %v1145_v43 }
 0x312   : > { %v1130_v42 = vadd.f32 %v1129_v39, %v1128_v35  ;;  %1580 = vmatprep.subr.mxu0 %v2135_v21 }
 0x313   : > { %1581 = vmatpush3.msra.mxu0 %v1144_v44 }
 0x314   : > { %1582 = vmatprep.subr.mxu0 %v2135_v21 }
 0x315   : > { %1583 = vmatpush3.msra.mxu0 %v1143_v47 }
 0x316   : > { %1584 = vmatprep.subr.mxu0 %v2135_v21 }
 0x317   : > { %1585 = vmatpush3.msra.mxu0 %v1142_v48 }
 0x3d0   : > { %v1048_v27 = vpop.f32.mrf.mxu0 }
 0x3d1   : > { %v1049_v58 = vadd.f32 %v1517_v23, %v1048_v27 }
 0x3d2   : > { %v1568_v29 = vpop.f32.mrf.mxu0 }
 0x3d3   : > { %vm1054_vm13 = vcmp.ge.f32.partialorder %v1049_v58, 0.0  ;;  %v1055_v30 = vmul.f32 0.01, %v1049_v58 }
 0x3d4   : > { %v1051_v31 = vpop.f32.mrf.mxu0 }
 0x3d5   : > { %v1056_v32 = vsel %vm1054_vm13, %v1049_v58, %v1055_v30 }
 0x3d6   : > { %v1057_v36 = vpack.c.bf16 %v1056_v32, %v1056_v32  ;;  %v1569_v37 = vpop.f32.mrf.mxu0 }
 0x3d8   : > { %1575 = vmatmul.mubr.msk.bf16.vlgmr.msra.gmra.mxu1 %vm909_vm12, %v1057_v36 }
 0x3d9   : > { %1590 = vmatpush3.msra.mxu1 %v1141_v38  ;;  %1597 = vmatprep.mubr.msk.f32.mxu1 %vm2136_vm1, %v2135_v21 }
 0x3da   : > { %1591 = vmatprep.subr.mxu1 %v2135_v21 }
 0x3db   : > { %1592 = vmatpush3.msra.mxu1 %v1140_v4 }
 0x3dc   : > { %1593 = vmatprep.subr.mxu1 %v2135_v21 }
 0x3dd   : > { %1594 = vmatpush3.msra.mxu1 %v1139_v40 }
 0x3de   : > { %1595 = vmatprep.subr.mxu1 %v2135_v21 }
 0x3df   : > { %1596 = vmatpush3.msra.mxu1 %v1138_v41 }
 0x3e0   : > { %1598 = vmatmul.mubr.msk.f32.vlgmr.msra.gmra.mxu1 %vm909_vm12, %v1130_v42 }
 0x498   : > { %v1118_v49 = vpop.f32.mrf.mxu1 }
 0x499   : > { %v1119_v50 = vadd.f32 %v1521_v57, %v1118_v49 }
 0x49a   : > { %v1576_v51 = vpop.f32.mrf.mxu1 }
 0x49b   : > { %v1131_v52 = vsel %vm909_vm12, %v1119_v50, 0.0 }
 0x49c   : > { %v1132_v53 = vrot.slane %v1131_v52, 4  ;;  %v1121_v24 = vpop.f32.mrf.mxu1 }
 0x49e   : > { %v1133_v54 = vadd.f32 %v1132_v53, %v1131_v52  ;;  %v1577_v55 = vpop.f32.mrf.mxu1 }
 0x4a0   : > { %v1134_v56 = vrot.slane %v1133_v54, 2  ;;  %v1288_v59 = vpop.f32.mrf.mxu1 }
 0x4a2   : > { %v1135_v60 = vadd.f32 %v1134_v56, %v1133_v54  ;;  %v1599_v61 = vpop.f32.mrf.mxu1 }
 0x4a4   : > { %v1136_v62 = vrot.slane %v1135_v60, 1 }
 0x4a6   : > { %v1137_v21 = vadd.f32 %v1136_v62, %v1135_v60 }
 0x4a8   : > { %1587 = vmatmul.mubr.msk.f32.vlgmr.msra.gmra.mxu0 %vm909_vm12, %v1137_v21 }
 0x568   : > { %v1215_v63 = vpop.f32.mrf.mxu0 }
 0x569   : > { %v1289_v1 = vadd.f32 %v1288_v59, %v1215_v63 }
 0x56a   : > { %v1588_v2 = vpop.f32.mrf.mxu0 }
 0x56b   : > { %v1293_v3 = vadd.f32 %v1292_v0, %v1289_v1 }
 0x56d   : > { %1294 = vst [vmem:[%s625_s26] sm:$0x1] %v1293_v3 }
 0x56e   : > { %2043 = shalt.err (!%p2040_p4)
}
 0x56f   : > { %s2044_s20 = scalar_lea.hbm %s1306_s13, 16  ;;  %s2048_s3 = scalar_lea.hbm %s2678_s25, 32 }
 0x570   : > { %p2045_p3 = scmp.ne.s32.totalorder %s1306_s13, %s2044_s20  ;;  %p2049_p10 = scmp.lt.s32.totalorder %s1306_s13, %s2678_s25 }
 0x571   : > { %p2050_p11 = scmp.lt.s32.totalorder %s2048_s3, %s2044_s20 }
 0x572   : > { %p2046_p0 = pnand %p2045_p3, %p2679_p7 }
 0x573   : > { %p2051_p12 = por %p2050_p11, %p2049_p10 }
 0x574   : > { %p2047_p2 = pneg %p2046_p0 }
 0x576   : > { %p2052_p13 = pnand %p2051_p12, %p2047_p2 }
 0x578   : > { %2055 = shalt.err (!%p2052_p13)
}
 0x579   : > { %1642 = dma.vmem_to_hbm [thread:$0]  (%p2679_p7), %s1309_s22, 16, %s1306_s13, %s1296_s6  }
 0x57a PF: > { %s1320_s26 = sand.u32 1, %s2106_s29   ;;  %p2680_p6 = scmp.ne.s32.totalorder %s2661_s7, 0 }
 0x57b   : > { %p2681_p5 = scmp.ge.s32.totalorder %s2118_s16, 2  ;;  %s1321_s21 = scalar_lea.sflag [#allocation4], %s1320_s26 }
 0x57d   : > { %p1680_p8 = pnand %p2681_p5, %p2680_p6 }
 0x57f   : > { %p1681_p9 = pneg %p1680_p8 }
 0x581   : > { %2101 = dma.done.wait (%p1681_p9), %s1321_s21, 16  }
 0x582   : > { %2103 = vsyncadd (%p1681_p9), %s1321_s21, 4294967280  ;;  %p33_p1 = scmp.ge.s32.totalorder %s2335_s28, 4   ;;  %s2682_s29 = smov %s2110_s30 }
 0x583   : > { %s2683_s30 = smov %s2114_s15  ;;  %s2684_s15 = smov %s2346_s27 }
 0x584   : > { %s2685_s16 = smov %s2335_s28  ;;  %35 = sbr.rel (!%p33_p1) target bundleno = 21 (0x15), region = 165 }
 0x589   :  { %1325 = vsyncpa [#allocation3], 1 }
 0x58a   :  { %1327 = vsyncpa [#allocation3 + $0x1], 1 }
 0x58b   :  { %1328 = vsyncpa [#allocation8], 1 }
 0x58c   :  { %1329 = vsyncpa [#allocation11], 1 }
 0x58d   :  { %1330 = vsyncpa [#allocation14], 1 }
 0x58e   :  { %1331 = vsyncpa [#allocation17], 1 }
 0x58f   :  { %1332 = vsyncpa [#allocation20], 1 }
 0x590   :  { %1333 = vsyncpa [#allocation4], 1 }
 0x591   :  { %1335 = vsyncpa [#allocation4 + $0x1], 1 }
 0x592   :  { %1336 = vsyncpa [#allocation5], 1 }
 0x593   :  { %1338 = vsyncpa [#allocation5 + $0x1], 1 }

</bundles_post_ra>
